<compile_context>
chip_gen: v7x
topology: tpu7x:2x2x1
jax: 0.10.0
libtpu: 0.0.40
codegen_flags: <defaults>
</compile_context>

<pallas_src>
import functools

import jax
import jax.numpy as jnp
from jax import lax
from jax.experimental import pallas as pl
from jax.experimental.pallas import tpu as pltpu


def _round_up(x, m):
    return ((x + m - 1) // m) * m


def _mlp_kernel(x_ref, w1_ref, b1_ref, gamma_ref, beta_ref, w2_ref, b2_ref,
                o_ref, *, ln_eps: float):
    # ---- layer1: x @ W1 + b1  (MXU, bf16 inputs / f32 accumulation) ----
    h = jnp.dot(x_ref[...], w1_ref[...],
                preferred_element_type=jnp.float32) + b1_ref[...]

    # ---- exact GELU (erf-based, matches torch.nn.functional.gelu default); f32 math ----
    h = 0.5 * h * (1.0 + lax.erf(h * jnp.float32(0.7071067811865476)))

    # ---- LayerNorm over the hidden axis (biased variance, eps inside rsqrt) ----
    mean = jnp.mean(h, axis=-1, keepdims=True)
    centered = h - mean
    var = jnp.mean(centered * centered, axis=-1, keepdims=True)
    hn = centered * lax.rsqrt(var + ln_eps) * gamma_ref[...] + beta_ref[...]

    # ---- Dropout: identity in eval / inference mode ----
    # TODO(synk): training-mode dropout (pltpu.prng_seed + prng_random_bits mask) not implemented.

    # ---- layer2: hn @ W2 + b2  (MXU, bf16 inputs / f32 accumulation) ----
    out = jnp.dot(hn.astype(w2_ref.dtype), w2_ref[...],
                  preferred_element_type=jnp.float32) + b2_ref[...]
    o_ref[...] = out.astype(o_ref.dtype)


def mlp_pallas(x, w1, b1, gamma, beta, w2, b2, *, ln_eps=1e-5,
               block_rows=256, compute_dtype=jnp.bfloat16):
    """x: [B, inp]; w1: [inp, H]; b1: [H]; gamma/beta: [H]; w2: [H, out]; b2: [out]."""
    B, inp = x.shape
    H = w1.shape[1]
    out = w2.shape[1]
    out_dtype = x.dtype

    # ---- row tiling: large MXU-friendly tiles, 16-aligned (bf16 sublane packing), padded batch ----
    bm = max(16, min(_round_up(block_rows, 16), _round_up(B, 16)))
    Bp = _round_up(B, bm)

    # ---- lane-dense classifier output: pad out features to a multiple of 128 ----
    out_p = _round_up(out, 128)

    x_p = x if Bp == B else jnp.pad(x, ((0, Bp - B), (0, 0)))
    w2_p = w2 if out_p == out else jnp.pad(w2, ((0, 0), (0, out_p - out)))
    b2_p = b2 if out_p == out else jnp.pad(b2, ((0, out_p - out),))

    # MXU operands in bf16; biases / LN params stay f32 (accuracy; add happens in f32).
    x_c = x_p.astype(compute_dtype)
    w1_c = w1.astype(compute_dtype)
    w2_c = w2_p.astype(compute_dtype)
    b1_2d = b1.reshape(1, H).astype(jnp.float32)
    gamma_2d = gamma.reshape(1, H).astype(jnp.float32)
    beta_2d = beta.reshape(1, H).astype(jnp.float32)
    b2_2d = b2_p.reshape(1, out_p).astype(jnp.float32)

    grid = (Bp // bm,)

    # Weights / biases / LN params never change across grid steps -> single buffer (halves
    # resident-weight VMEM versus the default double-buffering, with zero perf cost).
    resident = dict(pipeline_mode=pl.Buffered(buffer_count=1))

    # ---- explicit VMEM budget: single-buffered residents + double-buffered x/out tiles +
    #      f32 [bm, H] intermediates; capped at 64 MiB so it also fits v7x physical VMEM ----
    itemsize_c = jnp.dtype(compute_dtype).itemsize
    itemsize_o = jnp.dtype(out_dtype).itemsize
    vmem_need = (
        w1_c.size * itemsize_c + w2_c.size * itemsize_c
        + (b1_2d.size + gamma_2d.size + beta_2d.size + b2_2d.size) * 4
        + 2 * bm * inp * itemsize_c          # x tile, double-buffered
        + 2 * bm * out_p * itemsize_o        # out tile, double-buffered
        + 2 * bm * H * 4                     # h / hn f32 intermediates
    )
    vmem_limit = int(min(max(2 * vmem_need, 32 * 1024 * 1024), 64 * 1024 * 1024))

    cost = pl.CostEstimate(
        flops=int(2 * Bp * inp * H + 2 * Bp * H * out_p + 10 * Bp * H),
        transcendentals=int(Bp * H + Bp),        # erf per hidden element + rsqrt per row
        bytes_accessed=int(
            x_c.size * itemsize_c + w1_c.size * itemsize_c + w2_c.size * itemsize_c
            + (b1_2d.size + gamma_2d.size + beta_2d.size + b2_2d.size) * 4
            + Bp * out_p * itemsize_o),
    )

    kernel = functools.partial(_mlp_kernel, ln_eps=ln_eps)

    y_padded = pl.pallas_call(
        kernel,
        out_shape=jax.ShapeDtypeStruct((Bp, out_p), out_dtype),
        grid_spec=pltpu.PrefetchScalarGridSpec(
            num_scalar_prefetch=0,
            grid=grid,
            in_specs=[
                pl.BlockSpec((bm, inp), lambda i: (i, 0)),              # x tile (pipelined)
                pl.BlockSpec((inp, H), lambda i: (0, 0), **resident),    # W1 (resident)
                pl.BlockSpec((1, H), lambda i: (0, 0), **resident),      # b1
                pl.BlockSpec((1, H), lambda i: (0, 0), **resident),      # LN gamma
                pl.BlockSpec((1, H), lambda i: (0, 0), **resident),      # LN beta
                pl.BlockSpec((H, out_p), lambda i: (0, 0), **resident),  # W2 (resident)
                pl.BlockSpec((1, out_p), lambda i: (0, 0), **resident),  # b2
            ],
            out_specs=pl.BlockSpec((bm, out_p), lambda i: (i, 0)),
        ),
        compiler_params=pltpu.CompilerParams(
            dimension_semantics=("parallel",),   # row-tile axis shards across v7x's 2 TCs
            vmem_limit_bytes=vmem_limit,
        ),
        cost_estimate=cost,
    )(x_c, w1_c, b1_2d, gamma_2d, beta_2d, w2_c, b2_2d)

    return y_padded[:B, :out]


def mlp_reference(x, w1, b1, gamma, beta, w2, b2, ln_eps=1e-5,
                  compute_dtype=jnp.bfloat16):
    # Reference with the same bf16-matmul-input / f32-accumulate numerics as the kernel.
    h = jnp.dot(x.astype(compute_dtype), w1.astype(compute_dtype),
                preferred_element_type=jnp.float32) + b1
    h = 0.5 * h * (1.0 + lax.erf(h / jnp.sqrt(2.0)))
    mean = jnp.mean(h, axis=-1, keepdims=True)
    var = jnp.mean((h - mean) ** 2, axis=-1, keepdims=True)
    hn = (h - mean) * lax.rsqrt(var + ln_eps) * gamma + beta
    return jnp.dot(hn.astype(compute_dtype), w2.astype(compute_dtype),
                   preferred_element_type=jnp.float32) + b2


if __name__ == "__main__":
    # Small shapes consistent with MLP(inp_size, hidden_size, out_size, dropout) slot head.
    # B is deliberately NOT a multiple of the row tile to exercise the padding path.
    B, INP, HID, OUT = 40, 32, 64, 48

    key = jax.random.PRNGKey(0)
    k_x, k_w1, k_b1, k_w2, k_b2 = jax.random.split(key, 5)

    x = jax.random.normal(k_x, (B, INP), dtype=jnp.float32)

    # Deterministic synthetic parameters (uniform like PyTorch's Linear default range).
    bound1 = 1.0 / jnp.sqrt(INP)
    w1 = jax.random.uniform(k_w1, (INP, HID), jnp.float32, -bound1, bound1)
    b1 = jax.random.uniform(k_b1, (HID,), jnp.float32, -bound1, bound1)
    bound2 = 1.0 / jnp.sqrt(HID)
    w2 = jax.random.uniform(k_w2, (HID, OUT), jnp.float32, -bound2, bound2)
    b2 = jax.random.uniform(k_b2, (OUT,), jnp.float32, -bound2, bound2)
    gamma = jnp.ones((HID,), jnp.float32)   # LayerNorm weight init
    beta = jnp.zeros((HID,), jnp.float32)   # LayerNorm bias init

    # Use a small row tile in the demo so the padded grid has >1 step; real BERT-scale
    # calls should keep the default block_rows=256.
    y = mlp_pallas(x, w1, b1, gamma, beta, w2, b2, block_rows=16)
    y = jax.block_until_ready(y)

    y_ref = mlp_reference(x, w1, b1, gamma, beta, w2, b2)
    assert y.shape == (B, OUT)
    assert jnp.allclose(y, y_ref, atol=1e-2, rtol=1e-2), "mismatch vs reference"

    print("KERNEL_OK")
</pallas_src>

<mosaic_0001>
module attributes {stable_mosaic.version = 11 : i64} {
  func.func @_mlp_kernel(%arg0: i32, %arg1: memref<16x32xbf16, #tpu.memory_space<vmem>>, %arg2: memref<32x64xbf16, #tpu.memory_space<vmem>>, %arg3: memref<1x64xf32, #tpu.memory_space<vmem>>, %arg4: memref<1x64xf32, #tpu.memory_space<vmem>>, %arg5: memref<1x64xf32, #tpu.memory_space<vmem>>, %arg6: memref<64x128xbf16, #tpu.memory_space<vmem>>, %arg7: memref<1x128xf32, #tpu.memory_space<vmem>>, %arg8: memref<16x128xf32, #tpu.memory_space<vmem>>) attributes {dimension_semantics = [#tpu.dimension_semantics<parallel>], iteration_bounds = array<i64: 3>, scalar_prefetch = 0 : i64, scratch_operands = 0 : i64, tpu.core_type = #tpu.core_type<tc>, window_params = [{transform_indices = @transform_0, window_bounds = array<i64: 16, 32>}, {pipeline_mode = #tpu.pipeline_mode<synchronous>, transform_indices = @transform_1, window_bounds = array<i64: 32, 64>}, {pipeline_mode = #tpu.pipeline_mode<synchronous>, transform_indices = @transform_2, window_bounds = array<i64: 1, 64>}, {pipeline_mode = #tpu.pipeline_mode<synchronous>, transform_indices = @transform_3, window_bounds = array<i64: 1, 64>}, {pipeline_mode = #tpu.pipeline_mode<synchronous>, transform_indices = @transform_4, window_bounds = array<i64: 1, 64>}, {pipeline_mode = #tpu.pipeline_mode<synchronous>, transform_indices = @transform_5, window_bounds = array<i64: 64, 128>}, {pipeline_mode = #tpu.pipeline_mode<synchronous>, transform_indices = @transform_6, window_bounds = array<i64: 1, 128>}, {transform_indices = @transform_7, window_bounds = array<i64: 16, 128>}]} {
    %c0 = arith.constant 0 : index
    %c0_0 = arith.constant 0 : index
    %0 = vector.load %arg1[%c0, %c0_0] : memref<16x32xbf16, #tpu.memory_space<vmem>>, vector<16x32xbf16>
    %c0_1 = arith.constant 0 : index
    %c0_2 = arith.constant 0 : index
    %1 = vector.load %arg2[%c0_1, %c0_2] : memref<32x64xbf16, #tpu.memory_space<vmem>>, vector<32x64xbf16>
    %cst = arith.constant dense<0.000000e+00> : vector<16x64xf32>
    %2 = tpu.matmul %0, %1, %cst {dimension_numbers = #tpu.dot_dimension_numbers<[1], [0], [0], [1], [0, 0, 1, 1], [], []>} : vector<16x32xbf16>, vector<32x64xbf16>, vector<16x64xf32> -> vector<16x64xf32>
    %c0_3 = arith.constant 0 : index
    %c0_4 = arith.constant 0 : index
    %3 = vector.load %arg3[%c0_3, %c0_4] : memref<1x64xf32, #tpu.memory_space<vmem>>, vector<1x64xf32>
    %4 = vector.broadcast %3 : vector<1x64xf32> to vector<16x64xf32>
    %5 = arith.addf %2, %4 : vector<16x64xf32>
    %cst_5 = arith.constant 5.000000e-01 : f32
    %6 = vector.broadcast %cst_5 : f32 to vector<16x64xf32>
    %7 = arith.mulf %6, %5 : vector<16x64xf32>
    %cst_6 = arith.constant 0.707106769 : f32
    %8 = vector.broadcast %cst_6 : f32 to vector<16x64xf32>
    %9 = arith.mulf %5, %8 : vector<16x64xf32>
    %10 = math.erf %9 : vector<16x64xf32>
    %cst_7 = arith.constant 1.000000e+00 : f32
    %11 = vector.broadcast %cst_7 : f32 to vector<16x64xf32>
    %12 = arith.addf %11, %10 : vector<16x64xf32>
    %13 = arith.mulf %7, %12 : vector<16x64xf32>
    %cst_8 = arith.constant dense<0.000000e+00> : vector<16xf32>
    %14 = vector.multi_reduction <add>, %13, %cst_8 [1] : vector<16x64xf32> to vector<16xf32>
    %15 = vector.shape_cast %14 : vector<16xf32> to vector<16x1xf32>
    %cst_9 = arith.constant 6.400000e+01 : f32
    %16 = vector.broadcast %cst_9 : f32 to vector<16x1xf32>
    %17 = arith.divf %15, %16 : vector<16x1xf32>
    %18 = vector.broadcast %17 : vector<16x1xf32> to vector<16x64xf32>
    %19 = arith.subf %13, %18 : vector<16x64xf32>
    %20 = arith.mulf %19, %19 : vector<16x64xf32>
    %cst_10 = arith.constant dense<0.000000e+00> : vector<16xf32>
    %21 = vector.multi_reduction <add>, %20, %cst_10 [1] : vector<16x64xf32> to vector<16xf32>
    %22 = vector.shape_cast %21 : vector<16xf32> to vector<16x1xf32>
    %cst_11 = arith.constant 6.400000e+01 : f32
    %23 = vector.broadcast %cst_11 : f32 to vector<16x1xf32>
    %24 = arith.divf %22, %23 : vector<16x1xf32>
    %cst_12 = arith.constant 9.99999974E-6 : f32
    %25 = vector.broadcast %cst_12 : f32 to vector<16x1xf32>
    %26 = arith.addf %24, %25 : vector<16x1xf32>
    %27 = math.rsqrt %26 : vector<16x1xf32>
    %28 = vector.broadcast %27 : vector<16x1xf32> to vector<16x64xf32>
    %29 = arith.mulf %19, %28 : vector<16x64xf32>
    %c0_13 = arith.constant 0 : index
    %c0_14 = arith.constant 0 : index
    %30 = vector.load %arg4[%c0_13, %c0_14] : memref<1x64xf32, #tpu.memory_space<vmem>>, vector<1x64xf32>
    %31 = vector.broadcast %30 : vector<1x64xf32> to vector<16x64xf32>
    %32 = arith.mulf %29, %31 : vector<16x64xf32>
    %c0_15 = arith.constant 0 : index
    %c0_16 = arith.constant 0 : index
    %33 = vector.load %arg5[%c0_15, %c0_16] : memref<1x64xf32, #tpu.memory_space<vmem>>, vector<1x64xf32>
    %34 = vector.broadcast %33 : vector<1x64xf32> to vector<16x64xf32>
    %35 = arith.addf %32, %34 : vector<16x64xf32>
    %36 = arith.truncf %35 : vector<16x64xf32> to vector<16x64xbf16>
    %c0_17 = arith.constant 0 : index
    %c0_18 = arith.constant 0 : index
    %37 = vector.load %arg6[%c0_17, %c0_18] : memref<64x128xbf16, #tpu.memory_space<vmem>>, vector<64x128xbf16>
    %cst_19 = arith.constant dense<0.000000e+00> : vector<16x128xf32>
    %38 = tpu.matmul %36, %37, %cst_19 {dimension_numbers = #tpu.dot_dimension_numbers<[1], [0], [0], [1], [0, 0, 1, 1], [], []>} : vector<16x64xbf16>, vector<64x128xbf16>, vector<16x128xf32> -> vector<16x128xf32>
    %c0_20 = arith.constant 0 : index
    %c0_21 = arith.constant 0 : index
    %39 = vector.load %arg7[%c0_20, %c0_21] : memref<1x128xf32, #tpu.memory_space<vmem>>, vector<1x128xf32>
    %40 = vector.broadcast %39 : vector<1x128xf32> to vector<16x128xf32>
    %41 = arith.addf %38, %40 : vector<16x128xf32>
    %c0_22 = arith.constant 0 : index
    %c0_23 = arith.constant 0 : index
    %42 = vector.load %arg8[%c0_22, %c0_23] : memref<16x128xf32, #tpu.memory_space<vmem>>, vector<16x128xf32>
    tpu.vector_store %arg8[%c0_22, %c0_23], %41 {strides = array<i32>} : memref<16x128xf32, #tpu.memory_space<vmem>>, vector<16x128xf32>,
    return
  }
  func.func @transform_0(%arg0: i32) -> (i32, i32) {
    %c0_i32 = arith.constant 0 : i32
    %c0_i32_0 = arith.constant 0 : i32
    return %arg0, %c0_i32 : i32, i32
  }
  func.func @transform_1(%arg0: i32) -> (i32, i32) {
    %c0_i32 = arith.constant 0 : i32
    %c0_i32_0 = arith.constant 0 : i32
    %c0_i32_1 = arith.constant 0 : i32
    return %c0_i32, %c0_i32_0 : i32, i32
  }
  func.func @transform_2(%arg0: i32) -> (i32, i32) {
    %c0_i32 = arith.constant 0 : i32
    %c0_i32_0 = arith.constant 0 : i32
    %c0_i32_1 = arith.constant 0 : i32
    return %c0_i32, %c0_i32_0 : i32, i32
  }
  func.func @transform_3(%arg0: i32) -> (i32, i32) {
    %c0_i32 = arith.constant 0 : i32
    %c0_i32_0 = arith.constant 0 : i32
    %c0_i32_1 = arith.constant 0 : i32
    return %c0_i32, %c0_i32_0 : i32, i32
  }
  func.func @transform_4(%arg0: i32) -> (i32, i32) {
    %c0_i32 = arith.constant 0 : i32
    %c0_i32_0 = arith.constant 0 : i32
    %c0_i32_1 = arith.constant 0 : i32
    return %c0_i32, %c0_i32_0 : i32, i32
  }
  func.func @transform_5(%arg0: i32) -> (i32, i32) {
    %c0_i32 = arith.constant 0 : i32
    %c0_i32_0 = arith.constant 0 : i32
    %c0_i32_1 = arith.constant 0 : i32
    return %c0_i32, %c0_i32_0 : i32, i32
  }
  func.func @transform_6(%arg0: i32) -> (i32, i32) {
    %c0_i32 = arith.constant 0 : i32
    %c0_i32_0 = arith.constant 0 : i32
    %c0_i32_1 = arith.constant 0 : i32
    return %c0_i32, %c0_i32_0 : i32, i32
  }
  func.func @transform_7(%arg0: i32) -> (i32, i32) {
    %c0_i32 = arith.constant 0 : i32
    %c0_i32_0 = arith.constant 0 : i32
    return %arg0, %c0_i32 : i32, i32
  }
}

</mosaic_0001>

<bundles_post_ra>
// kernel: tpu_custom_call.1
= control target key start
LH: loop header
LB: loop body
LE: loop exit
PB: predicated region body
PF: predicated region fallthrough
CT: control target
= control target key end

     0   :  { %12 = vsyncpa [#allocation3], 0  ;;  %s932_s0 = inlined_call_operand.vmem [shape: bf16[48,32], index: 0, kind: input, shape index: {}]   ;;  %s933_s1 = inlined_call_operand.vmem [shape: bf16[32,64], index: 1, kind: input, shape index: {}]   ;;  %s934_s2 = inlined_call_operand.vmem [shape: f32[1,64], index: 2, kind: input, shape index: {}]   ;;  %s935_s3 = inlined_call_operand.vmem [shape: f32[1,64], index: 3, kind: input, shape index: {}]   ;;  %s936_s4 = inlined_call_operand.vmem [shape: f32[1,64], index: 4, kind: input, shape index: {}]   ;;  %s937_s5 = inlined_call_operand.vmem [shape: bf16[64,128], index: 5, kind: input, shape index: {}]   ;;  %s938_s6 = inlined_call_operand.vmem [shape: f32[1,128], index: 6, kind: input, shape index: {}]   ;;  %s939_s7 = inlined_call_operand.hbm [shape: f32[48,128], index: 7, kind: output, shape index: {}]  }
   0x1   :  { %14 = vsyncpa [#allocation3 + $0x1], 0  ;;  %s795_s24 = smov 0   ;;  %s797_s25 = smov 0  }
   0x2   :  { %s799_s26 = smov 0   ;;  %s801_s27 = smov 0  }
   0x3 LB: > { %s816_s28 = sadd.s32 4294967295, %s748_s27   ;;  %s574_s29 = sadd.s32 4294967294, %s748_s27   ;;  %s748_s27 = sphi %s801_s27, %s945_s27   ;;  %s744_s26 = sphi %s799_s26, %s944_s26   ;;  %s740_s25 = sphi %s797_s25, %s943_s25   ;;  %s736_s24 = sphi %s795_s24, %s942_s24  }
   0x4   : > { %s820_s30 = sadd.s32 1, %s748_s27   ;;  %s179_s8 = sadd.s32 1, %s744_s26 }
   0x5   : > { %s176_s9 = ssub.s32 %s748_s27, %s820_s30  ;;  %p189_p0 = scmp.ne.s32.totalorder %s744_s26, %s740_s25 }
   0x6   : > { %p177_p1 = scmp.eq.s32.totalorder %s176_s9, 0  ;;  %p190_p2 = scmp.eq.s32.totalorder %s816_s28, 2 }
   0x7   : > { %p195_p3 = scmp.ne.s32.totalorder %s740_s25, %s736_s24  ;;  %p196_p4 = scmp.eq.s32.totalorder %s574_s29, 2 }
   0x8   : > { %s831_s10 = scalar_select %p177_p1, %s744_s26, %s179_s8  }
   0x9   : > { %p833_p5 = por %p190_p2, %p189_p0  ;;  %p837_p6 = por %p196_p4, %p195_p3 }
   0xa   : > { %p577_p7 = scmp.ge.s32.totalorder %s748_s27, 1  ;;  %p241_p8 = scmp.lt.s32.totalorder %s748_s27, 4 }
   0xc   : > { %p242_p9 = pnand %p577_p7, %p241_p8 }
   0xd   : > { %v671_v0 = vld [vmem:[%s933_s1] sm:$0xff] (!%p242_p9)   ;;  %v750_v1 = vmov (!%p242_p9), 0.0   ;;  %v672_v2 = vld [vmem:[%s933_s1 + $0x8] sm:$0xff] (!%p242_p9)   ;;  %vm751_vm0 = vmmov (!%p242_p9), 0   ;;  %s579_s17 = sshll.u32 (!%p242_p9), %s816_s28, 1  ;;  %vm311_vm1 = vcmask (!%p242_p9), 261120  }
   0xe   : > { %245 = sbr.rel (%p242_p9) target bundleno = 806 (0x326), region = 48  ;;  %608 = vmatprep.subr.bf16.mxu0 (!%p242_p9), %v750_v1  ;;  %616 = vmatprep.subr.bf16.mxu1 (!%p242_p9), %v750_v1  ;;  %p274_p10 = scmp.lt.s32.totalorder (!%p242_p9), %s579_s17, 5  ;;  %v581_v4 = vld [vmem:[%s934_s2] ss:$0 sm:$0xff] (!%p242_p9)  ;;  %vm366_vm2 = vcmask (!%p242_p9), 523264   ;;  %v675_v34 = vld [vmem:[%s937_s5 + $0x8] sm:$0xff] (!%p242_p9)  }
   0xf   : > { %609 = vmatpush3.bf16.msra.mxu0 (!%p242_p9), %v671_v0  ;;  %612 = vmatprep.mubr.msk.bf16.mxu0 (!%p242_p9), %vm751_vm0, %v750_v1  ;;  %v674_v33 = vld [vmem:[%s937_s5] sm:$0xff] (!%p242_p9)   ;;  %v676_v35 = vld [vmem:[%s937_s5 + $0x10] sm:$0xff] (!%p242_p9)   ;;  %v677_v36 = vld [vmem:[%s937_s5 + $0x18] sm:$0xff] (!%p242_p9)   ;;  %s270_s22 = sand.u32 (!%p242_p9), 1, %s740_s25   ;;  %s599_s14 = sshll.u32 (!%p242_p9), %s816_s28, 8 }
  0x10   : > { %610 = vmatprep.subr.bf16.mxu0 (!%p242_p9), %v750_v1  ;;  %624 = vmatprep.mubr.msk.bf16.mxu1 (!%p242_p9), %vm751_vm0, %v750_v1  ;;  %v586_v45 = vld [vmem:[%s935_s3] ss:$0 sm:$0xff] (!%p242_p9)  ;;  %s578_s23 = sshll.u32 (!%p242_p9), %s270_s22, 4  ;;  %s752_s19 = smov (!%p242_p9), [#allocation2]  }
  0x11   : > { %617 = vmatpush3.bf16.msra.mxu1 (!%p242_p9), %v674_v33  ;;  %v587_v49 = vld [vmem:[%s936_s4] ss:$0 sm:$0xff] (!%p242_p9)  ;;  %s272_s9 = scalar_lea.vmem (!%p242_p9), [#allocation2], %s578_s23  ;;  %s690_s20 = sshll.u32 (!%p242_p9), %s752_s19, 4  ;;  %s691_s20 = int_to_ptr.vmem [resolvable:$false] %s690_s20 }
  0x12   : > { %618 = vmatprep.subr.bf16.mxu1 (!%p242_p9), %v750_v1  ;;  %v588_v54 = vld [vmem:[%s938_s6] ss:$0 sm:$0xff] (!%p242_p9)  ;;  %s512_s13 = sshll.u32 (!%p242_p9), %s272_s9, 4  ;;  %s884_s13 = int_to_ptr.vmem [resolvable:$true] %s512_s13 }
  0x13   : > { %611 = vmatpush3.bf16.msra.mxu0 (!%p242_p9), %v672_v2  ;;  %s686_s28 = scalar_lea.vmem (!%p242_p9), %s884_s13, 256  ;;  %p693_p0 = scmp.lt.s32.totalorder (!%p242_p9), %s884_s13, %s691_s20 }
  0x14   : > { %p687_p11 = scmp.ne.s32.totalorder (!%p242_p9), %s884_s13, %s686_s28 }
  0x15   : > { %s947_s17 = smov (!%p274_p10, %s579_s17), 5  ;;  %619 = vmatpush3.bf16.msra.mxu1 %v675_v34 }
  0x16   : > { %s580_s18 = sshll.u32 %s947_s17, 2  ;;  %620 = vmatprep.subr.bf16.mxu1 %v750_v1  ;;  %s889_s17 = scalar_lea.hbm %s939_s7, %s599_s14 }
  0x17   : > { %s277_s21 = scalar_lea.vmem %s932_s0, %s580_s18  ;;  %s891_s18 = scalar_lea.sflag [#allocation3], %s270_s22 }
  0x18   : > { %v673_v3 = vld [vmem:[%s277_s21] sm:$0xff]   ;;  %p688_p12 = pnand %p687_p11, %p833_p5  ;;  %s692_s21 = scalar_lea.vmem %s691_s20, 512 }
  0x19   : > { %613 = vmatmul.mubr.msk.bf16.vlgmr.msra.gmra.mrb[0].mxu0 %vm311_vm1, %v673_v3  ;;  %621 = vmatpush3.bf16.msra.mxu1 %v676_v35  ;;  %p694_p1 = scmp.lt.s32.totalorder %s692_s21, %s686_s28 }
  0x1a   : > { %622 = vmatprep.subr.bf16.mxu1 %v750_v1  ;;  %p689_p13 = pneg %p688_p12 }
  0x1b   : > { %p695_p2 = por %p694_p1, %p693_p0 }
  0x1d   : > { %623 = vmatpush3.bf16.msra.mxu1 %v677_v36  ;;  %p696_p3 = pnand %p695_p2, %p689_p13 }
  0xec   : > { %v349_v5 = vpop.f32.mrb[0].mxu0 }
  0xed   : > { %v350_v6 = vadd.f32 %v581_v4, %v349_v5  ;;  %v614_v7 = vpop.f32.mrb[1].mxu0 }
  0xee   : > { %v352_v8 = vpop.f32.mrb[2].mxu0 }
  0xef   : > { %v358_v9 = vmul.f32 0.70710677, %v350_v6  ;;  %v353_v10 = vadd.f32 %v581_v4, %v352_v8  ;;  %v615_v11 = vpop.f32.mrb[3].mxu0  ;;  %v356_v14 = vmul.f32 0.5, %v350_v6 }
  0xf1   : > { %678 = verf.f32 %v358_v9  ;;  %v359_v12 = vmul.f32 0.70710677, %v353_v10  ;;  %v357_v17 = vmul.f32 0.5, %v353_v10 }
  0xf3   : > { %680 = verf.f32 %v359_v12 }
  0xfb   : > { %v679_v13 = vpop.eup %678 }
  0xfc   : > { %v362_v15 = vadd.f32 1.0, %v679_v13 }
  0xfd   : > { %v681_v16 = vpop.eup %680 }
  0xfe   : > { %v364_v18 = vmul.f32 %v362_v15, %v356_v14  ;;  %v363_v19 = vadd.f32 1.0, %v681_v16 }
 0x100   : > { %v367_v20 = vsel %vm366_vm2, %v364_v18, 0.0  ;;  %v365_v21 = vmul.f32 %v363_v19, %v357_v17 }
 0x101   : > { %368 = vadd.xlane.f32.xlu0 %v367_v20 }
 0x102   : > { %v370_v22 = vsel %vm366_vm2, %v365_v21, 0.0 }
 0x105   : > { %371 = vadd.xlane.f32.xlu0 %v370_v22 }
 0x18e   : > { %v369_v23 = vpop.xlane.xlu0 %368 }
 0x18f   : > { %v374_v24 = vmul.f32 0.015625, %v369_v23 }
 0x191   : > { %v376_v25 = vsub.f32 %v364_v18, %v374_v24 }
 0x192   : > { %v372_v26 = vpop.xlane.xlu0 %371 }
 0x193   : > { %v375_v27 = vmul.f32 0.015625, %v372_v26  ;;  %v378_v28 = vmul.f32 %v376_v25, %v376_v25 }
 0x195   : > { %v377_v29 = vsub.f32 %v365_v21, %v375_v27  ;;  %v380_v30 = vsel %vm366_vm2, %v378_v28, 0.0 }
 0x196   : > { %381 = vadd.xlane.f32.xlu1 %v380_v30 }
 0x197   : > { %v379_v31 = vmul.f32 %v377_v29, %v377_v29 }
 0x199   : > { %v383_v32 = vsel %vm366_vm2, %v379_v31, 0.0 }
 0x19a   : > { %384 = vadd.xlane.f32.xlu1 %v383_v32 }
 0x223   : > { %v382_v37 = vpop.xlane.xlu1 %381 }
 0x224   : > { %v386_v38 = vmul.f32 0.015625, %v382_v37 }
 0x226   : > { %v388_v39 = vadd.f32 1e-05, %v386_v38 }
 0x227   : > { %v385_v40 = vpop.xlane.xlu1 %384 }
 0x228   : > { %682 = vrsqrt.f32 %v388_v39  ;;  %v387_v41 = vmul.f32 0.015625, %v385_v40 }
 0x22a   : > { %v389_v42 = vadd.f32 1e-05, %v387_v41 }
 0x22c   : > { %684 = vrsqrt.f32 %v389_v42 }
 0x232   : > { %v683_v43 = vpop.eup %682 }
 0x233   : > { %v392_v44 = vmul.f32 %v683_v43, %v376_v25 }
 0x235   : > { %v401_v48 = vmul.f32 %v586_v45, %v392_v44 }
 0x236   : > { %v685_v46 = vpop.eup %684 }
 0x237   : > { %v393_v47 = vmul.f32 %v685_v46, %v377_v29  ;;  %v410_v51 = vadd.f32 %v587_v49, %v401_v48 }
 0x239   : > { %v402_v50 = vmul.f32 %v586_v45, %v393_v47 }
 0x23b   : > { %v411_v52 = vadd.f32 %v587_v49, %v402_v50 }
 0x23d   : > { %v412_v53 = vpack.c.bf16 %v411_v52, %v410_v51 }
 0x23f   : > { %625 = vmatmul.mubr.msk.bf16.vlgmr.msra.gmra.mrb[0].mxu1 %vm366_vm2, %v412_v53 }
 0x312   : > { %v489_v55 = vpop.f32.mrb[0].mxu1 }
 0x313   : > { %v490_v56 = vadd.f32 %v588_v54, %v489_v55  ;;  %v626_v57 = vpop.f32.mrb[1].mxu1 }
 0x314   : > { %v492_v58 = vpop.f32.mrb[2].mxu1 }
 0x315   : > { %496 = vst [vmem:[%s272_s9] sm:$0xff] %v490_v56  ;;  %v493_v59 = vadd.f32 %v588_v54, %v492_v58  ;;  %v627_v60 = vpop.f32.mrb[3].mxu1 }
 0x317   : > { %497 = vst [vmem:[%s272_s9 + $0x8] sm:$0xff] %v493_v59 }
 0x318   : > { %699 = shalt.err (!%p696_p3)
}
 0x319   : > { %s700_s22 = scalar_lea.hbm %s889_s17, 256  ;;  %s704_s8 = scalar_lea.hbm %s939_s7, 768 }
 0x31a   : > { %p701_p4 = scmp.ne.s32.totalorder %s889_s17, %s700_s22  ;;  %p705_p9 = scmp.lt.u32.totalorder %s889_s17, %s939_s7 }
 0x31b   : > { %p706_p10 = scmp.lt.u32.totalorder %s704_s8, %s700_s22  ;;  %p708_p12 = scmp.lt.u32.totalorder %s700_s22, %s889_s17 }
 0x31c   : > { %p702_p7 = pnand %p701_p4, %p833_p5 }
 0x31d   : > { %p707_p11 = por %p706_p10, %p705_p9 }
 0x31e   : > { %p703_p8 = pneg %p702_p7 }
 0x31f   : > { %p709_p13 = por %p708_p12, %p707_p11 }
 0x321   : > { %p710_p0 = pnand %p709_p13, %p703_p8 }
 0x323   : > { %713 = shalt.err (!%p710_p0)
}
 0x324   : > { %s753_s15 = smov 128   ;;  %s754_s16 = smov 8  }
 0x325   : > { %628 = dma.vmem_to_hbm [thread:$0]  (%p833_p5), %s884_s13, 256, %s889_s17, %s891_s18, %s753_s15, %s753_s15, %s754_s16  }
 0x326 PF: > { %p634_p1 = scmp.ge.s32.totalorder %s748_s27, 2  ;;  %s527_s28 = sand.u32 1, %s736_s24  }
 0x327   : > { %s528_s19 = scalar_lea.sflag [#allocation3], %s527_s28 }
 0x328   : > { %p631_p2 = pnand %p634_p1, %p837_p6 }
 0x32a   : > { %731 = dma.done.wait (!%p631_p2), %s528_s19, 256  }
 0x32b   : > { %733 = vsyncadd (!%p631_p2), %s528_s19, 4294967040  ;;  %p17_p3 = scmp.ge.s32.totalorder %s820_s30, 5   ;;  %s942_s24 = smov %s740_s25 }
 0x32c   : > { %s943_s25 = smov %s744_s26  ;;  %s944_s26 = smov %s831_s10 }
 0x32d   : > { %s945_s27 = smov %s820_s30  ;;  %19 = sbr.rel (!%p17_p3) target bundleno = 3 (0x3), region = 83 }
 0x334   :  { %533 = vsyncpa [#allocation3], 1 }
 0x335   :  { %535 = vsyncpa [#allocation3 + $0x1], 1 }

</bundles_post_ra>
